<compile_context>
chip_gen: v6e
topology: v6e:2x2x1
jax: 0.10.0
libtpu: 0.0.40
codegen_flags: <defaults>
</compile_context>

<pallas_src>
import jax
import jax.numpy as jnp
from jax import lax
from jax.experimental import pallas as pl
from jax.experimental.pallas import tpu as pltpu


def _round_up(a, b):
    return ((a + b - 1) // b) * b


def _tile_n(n):
    """Pick (tn, Np): pad N only to a 128-lane multiple; small N unpadded."""
    if n <= 128:
        # Full-extent block (block dims == array dims bypass the (8,128) rule).
        return n, n
    np_ = _round_up(n, 128)
    for tn in (512, 256, 128):
        if np_ % tn == 0:
            return tn, np_
    return 128, np_  # unreachable


def _tile_k(d, tn, itemsize):
    """Pick (tk, Dp); use full-extent K (no K grid axis) whenever it fits."""
    budget = 10 * 1024 * 1024  # double-buffered 2-operand input budget
    if 4 * tn * d * itemsize <= budget:
        return d, d
    tk = 512
    return tk, _round_up(d, tk)


def _gram_kernel(a_ref, b_ref, o_ref):
    # a_ref: [tn, tk] rows i of x ; b_ref: [tn, tk] rows j of x ; o_ref: [tn, tn]
    # o_ref is f32 and resident across the K axis -> accumulate into it directly.
    @pl.when(pl.program_id(2) == 0)
    def _():
        o_ref[...] = jnp.zeros_like(o_ref)

    o_ref[...] += lax.dot_general(
        a_ref[...], b_ref[...],
        dimension_numbers=(((1,), (1,)), ((), ())),   # A @ B.T on the MXU
        preferred_element_type=jnp.float32)


def gram_matrix(x, *, compute_dtype=jnp.float32):
    """x @ x.T via a tiled Pallas MXU matmul.

    Returns (gram_padded [Np, Np] float32, Np).  Padding rows/cols hold zeros
    contributed by zero-padded inputs; callers index only the first N rows/cols.
    """
    N, D = x.shape
    itemsize = jnp.dtype(compute_dtype).itemsize
    tn, Np = _tile_n(N)
    tk, Dp = _tile_k(D, tn, itemsize)

    xp = x.astype(compute_dtype)
    if (Np, Dp) != (N, D):
        xp = jnp.pad(xp, ((0, Np - N), (0, Dp - D)))  # zeros keep dots exact

    grid = (Np // tn, Np // tn, Dp // tk)

    # Working-set estimate: 2 operands x 2 buffers + output tile (x2 margin).
    est_vmem = 4 * tn * tk * itemsize + 2 * tn * tn * 4
    vmem_limit = None
    if est_vmem > 12 * 1024 * 1024:
        vmem_limit = int(min(2 * est_vmem, 64 * 1024 * 1024))

    gram = pl.pallas_call(
        _gram_kernel,
        out_shape=jax.ShapeDtypeStruct((Np, Np), jnp.float32),
        grid_spec=pltpu.PrefetchScalarGridSpec(
            num_scalar_prefetch=0,
            grid=grid,
            in_specs=[
                pl.BlockSpec((tn, tk), lambda i, j, k: (i, k)),   # rows i of x
                pl.BlockSpec((tn, tk), lambda i, j, k: (j, k)),   # rows j of x
            ],
            out_specs=pl.BlockSpec((tn, tn), lambda i, j, k: (i, j)),
        ),
        compiler_params=pltpu.CompilerParams(
            dimension_semantics=("parallel", "parallel", "arbitrary"),
            vmem_limit_bytes=vmem_limit,
        ),
        cost_estimate=pl.CostEstimate(
            flops=2 * Np * Np * Dp,
            transcendentals=0,
            bytes_accessed=2 * Np * Dp * itemsize + Np * Np * 4,
        ),
    )(xp, xp)

    return gram, Np


def infer_links_head(x, complete_edge_index, y_true, weight, bias,
                     *, compute_dtype=jnp.float32):
    """Pallas implementation of InferLinksHead.forward.

    Args:
      x:                   [N, D] float32 node features.
      complete_edge_index: [2, E] int32 edge endpoints (complete graph).
      y_true:              [E]    edge labels (passed through untouched).
      weight:              [2, 1] float32 (torch Linear(1, 2).weight).
      bias:                [2]    float32 (torch Linear(1, 2).bias).
      compute_dtype:       matmul input dtype (jnp.bfloat16 for native MXU
                           rate; accumulation is always f32).
    Returns:
      (pred [E, 2] float32, y_true)
    """
    # Hot path: all pairwise dot products on the MXU.
    gram, Np = gram_matrix(x, compute_dtype=compute_dtype)     # [Np, Np] f32

    # Per-edge lookup: flat 1-D take on the *padded* Gram matrix (no [:N,:N]
    # slice, no 2-D gather).  All indices are < N so padding is never read.
    src = complete_edge_index[0].astype(jnp.int32)
    dst = complete_edge_index[1].astype(jnp.int32)
    s = jnp.take(gram.reshape(-1), src * Np + dst)              # [E]

    # 4-parameter affine head (torch Linear(1, 2)); kept in the wrapper so the
    # Pallas output stays lane-dense instead of a 2-wide masked store.
    w_t = weight.astype(jnp.float32).T.reshape(1, 2)            # [1, 2]
    b_r = bias.astype(jnp.float32).reshape(1, 2)                # [1, 2]
    pred = s[:, None] * w_t + b_r                               # [E, 2]

    return pred, y_true


def _reference(x, complete_edge_index, y_true, weight, bias):
    g = x[complete_edge_index]                  # [2, E, D]
    s = (g[0] * g[1]).sum(axis=1)               # [E]
    y = s[:, None] * weight.T + bias[None, :]   # [E, 2]
    return y, y_true


if __name__ == "__main__":
    key = jax.random.PRNGKey(0)
    k1, k2, k3, k4 = jax.random.split(key, 4)

    N, D = 8, 32                      # nodes, hidden dim
    # complete graph edge index: all (i, j) pairs -> E = N*N = 64
    ii, jj = jnp.meshgrid(jnp.arange(N), jnp.arange(N), indexing="ij")
    complete_edge_index = jnp.stack(
        [ii.reshape(-1), jj.reshape(-1)], axis=0
    ).astype(jnp.int32)               # [2, 64]
    E = complete_edge_index.shape[1]

    x = jax.random.normal(k1, (N, D), dtype=jnp.float32)
    y_true = jax.random.randint(k2, (E,), 0, 2).astype(jnp.int32)

    # Deterministic parameters for torch.nn.Linear(1, 2) (dim_out forced to 2
    # by cfg.dataset.infer_link_label == 'edge').
    weight = jax.random.normal(k3, (2, 1), dtype=jnp.float32) * 0.5
    bias = jax.random.normal(k4, (2,), dtype=jnp.float32) * 0.1

    ref_pred, ref_true = _reference(x, complete_edge_index, y_true, weight, bias)

    # f32 path: exact against the reference.
    pred, true = infer_links_head(x, complete_edge_index, y_true, weight, bias)
    pred = jax.block_until_ready(pred)
    assert pred.shape == (E, 2)
    assert jnp.allclose(pred, ref_pred, atol=1e-5, rtol=1e-5)
    assert jnp.array_equal(true, ref_true)

    # bf16-input path (native MXU rate, f32 accumulation): looser tolerance.
    pred_bf16, _ = infer_links_head(x, complete_edge_index, y_true, weight,
                                    bias, compute_dtype=jnp.bfloat16)
    pred_bf16 = jax.block_until_ready(pred_bf16)
    assert jnp.allclose(pred_bf16, ref_pred, atol=5e-2, rtol=5e-2)

    print("KERNEL_OK")
</pallas_src>

<mosaic_0001>
module attributes {stable_mosaic.version = 11 : i64} {
  func.func @_gram_kernel(%arg0: i32, %arg1: i32, %arg2: i32, %arg3: memref<8x32xf32, #tpu.memory_space<vmem>>, %arg4: memref<8x32xf32, #tpu.memory_space<vmem>>, %arg5: memref<8x8xf32, #tpu.memory_space<vmem>>) attributes {dimension_semantics = [#tpu.dimension_semantics<parallel>, #tpu.dimension_semantics<parallel>, #tpu.dimension_semantics<arbitrary>], iteration_bounds = array<i64: 1, 1, 1>, scalar_prefetch = 0 : i64, scratch_operands = 0 : i64, tpu.core_type = #tpu.core_type<tc>, window_params = [{transform_indices = @transform_0, window_bounds = array<i64: 8, 32>}, {transform_indices = @transform_1, window_bounds = array<i64: 8, 32>}, {transform_indices = @transform_2, window_bounds = array<i64: 8, 8>}]} {
    %c0_i32 = arith.constant 0 : i32
    %0 = arith.cmpi eq, %arg2, %c0_i32 : i32
    %1 = arith.extui %0 : i1 to i32
    %c0_i32_0 = arith.constant 0 : i32
    %2 = arith.cmpi ne, %1, %c0_i32_0 : i32
    scf.if %2 {
      %cst_8 = arith.constant 0.000000e+00 : f32
      %9 = vector.broadcast %cst_8 : f32 to vector<8x8xf32>
      %c0_9 = arith.constant 0 : index
      %c0_10 = arith.constant 0 : index
      %10 = vector.load %arg5[%c0_9, %c0_10] : memref<8x8xf32, #tpu.memory_space<vmem>>, vector<8x8xf32>
      tpu.vector_store %arg5[%c0_9, %c0_10], %9 {strides = array<i32>} : memref<8x8xf32, #tpu.memory_space<vmem>>, vector<8x8xf32>,
    } else {
    }
    %c0 = arith.constant 0 : index
    %c0_1 = arith.constant 0 : index
    %3 = vector.load %arg5[%c0, %c0_1] : memref<8x8xf32, #tpu.memory_space<vmem>>, vector<8x8xf32>
    %c0_2 = arith.constant 0 : index
    %c0_3 = arith.constant 0 : index
    %4 = vector.load %arg3[%c0_2, %c0_3] : memref<8x32xf32, #tpu.memory_space<vmem>>, vector<8x32xf32>
    %c0_4 = arith.constant 0 : index
    %c0_5 = arith.constant 0 : index
    %5 = vector.load %arg4[%c0_4, %c0_5] : memref<8x32xf32, #tpu.memory_space<vmem>>, vector<8x32xf32>
    %cst = arith.constant dense<0.000000e+00> : vector<8x8xf32>
    %6 = tpu.matmul %4, %5, %cst {dimension_numbers = #tpu.dot_dimension_numbers<[1], [1], [0], [0], [0, 0, 1, 0], [], []>} : vector<8x32xf32>, vector<8x32xf32>, vector<8x8xf32> -> vector<8x8xf32>
    %7 = arith.addf %3, %6 : vector<8x8xf32>
    %c0_6 = arith.constant 0 : index
    %c0_7 = arith.constant 0 : index
    %8 = vector.load %arg5[%c0_6, %c0_7] : memref<8x8xf32, #tpu.memory_space<vmem>>, vector<8x8xf32>
    tpu.vector_store %arg5[%c0_6, %c0_7], %7 {strides = array<i32>} : memref<8x8xf32, #tpu.memory_space<vmem>>, vector<8x8xf32>,
    return
  }
  func.func @transform_0(%arg0: i32, %arg1: i32, %arg2: i32) -> (i32, i32) {
    %c0_i32 = arith.constant 0 : i32
    return %arg0, %arg2 : i32, i32
  }
  func.func @transform_1(%arg0: i32, %arg1: i32, %arg2: i32) -> (i32, i32) {
    %c0_i32 = arith.constant 0 : i32
    return %arg1, %arg2 : i32, i32
  }
  func.func @transform_2(%arg0: i32, %arg1: i32, %arg2: i32) -> (i32, i32) {
    %c0_i32 = arith.constant 0 : i32
    return %arg0, %arg1 : i32, i32
  }
}

</mosaic_0001>

<bundles_post_ra>
// kernel: tpu_custom_call.1
= control target key start
LH: loop header
LB: loop body
LE: loop exit
PB: predicated region body
PF: predicated region fallthrough
CT: control target
= control target key end

     0   :  { %7 = vsyncpa [#allocation3], 0  ;;  %s252_s0 = inlined_call_operand.hbm [shape: f32[8,32], index: 0, kind: input, shape index: {}]   ;;  %s253_s1 = inlined_call_operand.hbm [shape: f32[8,32], index: 1, kind: input, shape index: {}]   ;;  %s254_s2 = inlined_call_operand.hbm [shape: f32[8,8], index: 2, kind: output, shape index: {}]  }
   0x1   :  { %8 = vsyncpa [#allocation6], 0 }
   0x2   :  { %9 = vsyncpa [#allocation4], 0  ;;  %s221_s9 = smov [#allocation2]   ;;  %s222_s11 = smov [#allocation5]  }
   0x3   :  { %s16_s10 = sshll.u32 %s221_s9, 4  ;;  %s26_s12 = sshll.u32 %s222_s11, 4  ;;  %s17_s10 = int_to_ptr.vmem [resolvable:$true] %s16_s10  ;;  %s27_s12 = int_to_ptr.vmem [resolvable:$true] %s26_s12 }
   0x4   :  { %s163_s13 = scalar_lea.vmem %s17_s10, 128  ;;  %p168_p1 = scmp.lt.s32.totalorder %s17_s10, %s17_s10 }
   0x5   :  { %p164_p0 = scmp.ne.s32.totalorder %s17_s10, %s163_s13  ;;  %p169_p2 = scmp.lt.s32.totalorder %s163_s13, %s163_s13 }
   0x7   :  { %p170_p3 = por %p169_p2, %p168_p1 }
   0x9   :  { %p171_p4 = pnand %p170_p3, %p164_p0 }
   0xb   :  { %174 = shalt.err (!%p171_p4)
}
   0xc   :  { %19 = dma.hbm_to_vmem [thread:$0]  %s252_s0, 128, %s17_s10, [#allocation3]  }
   0xd   :  { %s183_s16 = scalar_lea.vmem %s27_s12, 128  ;;  %p188_p6 = scmp.lt.s32.totalorder %s27_s12, %s27_s12 }
   0xe   :  { %p184_p5 = scmp.ne.s32.totalorder %s27_s12, %s183_s16  ;;  %p189_p7 = scmp.lt.s32.totalorder %s183_s16, %s183_s16 }
  0x10   :  { %p190_p8 = por %p189_p7, %p188_p6 }
  0x12   :  { %p191_p9 = pnand %p190_p8, %p184_p5 }
  0x14   :  { %194 = shalt.err (!%p191_p9)
}
  0x15   :  { %29 = dma.hbm_to_vmem [thread:$0]  %s253_s1, 128, %s27_s12, [#allocation6]  }
  0x16   :  { %215 = dma.done.wait [#allocation3], 128  }
  0x17   :  { %216 = vsyncadd [#allocation3], 4294967168 }
  0x18   :  { %217 = dma.done.wait [#allocation6], 128  }
  0x19   :  { %218 = vsyncadd [#allocation6], 4294967168  ;;  %vm40_vm0 = vcmask 64512   ;;  %v223_v0 = vmov 0.0   ;;  %vm224_vm1 = vmmov 0   ;;  %vm45_vm2 = vcmask 261120  }
  0x1a   :  { %41 = vst.msk [vmem:[#allocation7] sm:$0xff] %vm40_vm0, %v223_v0  ;;  %145 = vmatprep.subr.mxu0 %v223_v0  ;;  %147 = vmatprep.mubr.msk.f32.mxu0 %vm224_vm1, %v223_v0  ;;  %v44_v1 = vld [vmem:[#allocation5] sm:$0xff]  ;;  %v43_v2 = vld [vmem:[#allocation2] sm:$0xff]  ;;  %s225_s0 = smov [#allocation7]  }
  0x1b   :  { %146 = vmatpush3.xpose.msk.msra.mxu0 %vm45_vm2, %v44_v1  ;;  %s131_s19 = sshll.u32 %s225_s0, 4  ;;  %s132_s19 = int_to_ptr.vmem [resolvable:$true] %s131_s19 }
  0x1c   :  { %s195_s1 = scalar_lea.vmem %s132_s19, 128  ;;  %p200_p11 = scmp.lt.s32.totalorder %s132_s19, %s132_s19 }
  0x1d   :  { %p196_p10 = scmp.ne.s32.totalorder %s132_s19, %s195_s1  ;;  %p201_p12 = scmp.lt.s32.totalorder %s195_s1, %s195_s1 }
  0x1e   :  { %148 = vmatmul.mubr.msk.f32.vlgmr.msra.gmra.mxu0 %vm45_vm2, %v43_v2 }
  0x1f   :  { %p202_p13 = por %p201_p12, %p200_p11 }
  0x21   :  { %v42_v3 = vld [vmem:[#allocation7] sm:$0xff]  ;;  %p203_p0 = pnand %p202_p13, %p196_p10 }
  0xde   :  { %v118_v4 = vpop.f32.mrf.mxu0 }
  0xdf   :  { %v122_v5 = vadd.f32 %v118_v4, %v42_v3 }
  0xe0   :  { %v149_v6 = vpop.f32.mrf.mxu0 }
  0xe1   :  { %124 = vst.msk [vmem:[#allocation7] sm:$0xff] %vm40_vm0, %v122_v5 }
  0xe2   :  { %206 = shalt.err (!%p203_p0)
}
  0xe3   :  { %134 = dma.vmem_to_hbm [thread:$0]  %s132_s19, 128, %s254_s2, [#allocation4]  }
  0xe4   :  { %219 = dma.done.wait [#allocation4], 128  }
  0xe5   :  { %220 = vsyncadd [#allocation4], 4294967168 }
  0xe6   :  { %138 = vsyncpa [#allocation3], 1 }
  0xe7   :  { %139 = vsyncpa [#allocation6], 1 }
  0xe8   :  { %140 = vsyncpa [#allocation4], 1 }

</bundles_post_ra>
